<compile_context>
chip_gen: v6e
topology: v6e:2x2x1
jax: 0.10.0
libtpu: 0.0.40
codegen_flags: <defaults>
</compile_context>

<pallas_src>
import jax
import jax.numpy as jnp
from jax import lax
from jax.experimental import pallas as pl
from jax.experimental.pallas import tpu as pltpu

H = W = 28                 # spatial size implied by fc = 64*14*14 with a 2x2 pool
C_OUT = 64
KH = KW = 3
PH, PW = H // 2, W // 2    # 14, 14
NPOOL = PH * PW            # 196 pooled cells per image
G = 4                      # pooled cells packed per conv-matmul row (block-diag weights)
RR = NPOOL // G            # 49 row-groups per image
TAPK = 16                  # 9 conv taps padded to 16
KL = G * TAPK              # 64   lane width of the packed patch matrix
NL = G * C_OUT             # 256  lane width of the conv output slab
FEAT = RR * NL             # 12544 = 64*14*14
BT_MAX = 128               # images per grid step (cap)


def _round8(v):
    return ((v + 7) // 8) * 8


def _make_kernel(BT):
    """Fused conv+bias+ReLU+maxpool+FC kernel for a batch tile of BT images."""

    def kernel(p_ref, wc_ref, cb_ref, wf_ref, fb_ref, o_ref):
        # p_ref : [RR, 4*BT, KL]  bf16 packed im2col patches, rows within rr = (t, b)
        # wc_ref: [KL, NL]        bf16 block-diagonal conv weights (G copies of [16,64])
        # cb_ref: [1, NL]         f32 conv bias tiled G times
        # wf_ref: [RR, NL, NCLSP] bf16 fc weights in (rr, u, c) row order, class-padded
        # fb_ref: [1, NCLSP]      f32 fc bias (zero padded)
        # o_ref : [BT, NCLSP]     f32 logits for BT images
        wc = wc_ref[...]                      # hoisted: conv RHS loaded once per step
        cb = cb_ref[...]
        o_ref[...] = jnp.zeros_like(o_ref)

        def body(rr, carry):
            pv = p_ref[rr]                                            # [4*BT, KL] bf16
            # conv for all 4 pool-window positions of this row-group in ONE dot
            cv = jnp.dot(pv, wc, preferred_element_type=jnp.float32)  # [4*BT, NL] f32
            cv = jnp.maximum(cv + cb, 0.0)                            # bias + ReLU
            # 2x2 maxpool = elementwise max over the 4 position slices
            pooled = jnp.maximum(jnp.maximum(cv[0 * BT:1 * BT], cv[1 * BT:2 * BT]),
                                 jnp.maximum(cv[2 * BT:3 * BT], cv[3 * BT:4 * BT]))
            # partial FC accumulate for this row-group (K tiled over rr)
            o_ref[...] += jnp.dot(pooled.astype(jnp.bfloat16), wf_ref[rr],
                                  preferred_element_type=jnp.float32)
            return carry

        lax.fori_loop(0, RR, body, 0)
        o_ref[...] += fb_ref[...]

    return kernel


def simple_cnn_forward(x, conv_w, conv_b, fc_w, fc_b):
    # x: [N, 1, 28, 28] float32 (NCHW, as in PyTorch)
    N = x.shape[0]
    num_classes = fc_w.shape[0]
    ncls_pad = max(128, ((num_classes + 127) // 128) * 128)

    # Batch tiling: cap at BT_MAX, target >=2 grid steps when the batch allows.
    n8 = _round8(max(N, 1))
    BT = min(BT_MAX, max(8, _round8(-(-n8 // 2))))
    n_pad = ((n8 + BT - 1) // BT) * BT
    gt = n_pad // BT

    # --- glue: pack im2col patches in bf16, layout [(g, rr), (t, b), KL] -------------
    xb = jnp.pad(x[:, 0], ((0, n_pad - N), (1, 1), (1, 1))).astype(jnp.bfloat16)
    taps = jnp.stack([xb[:, ki:ki + H, kj:kj + W]
                      for ki in range(KH) for kj in range(KW)], axis=-1)  # [n,28,28,9]
    taps = jnp.pad(taps, ((0, 0), (0, 0), (0, 0), (0, TAPK - KH * KW)))   # taps -> 16
    taps = taps.reshape(n_pad, PH, 2, PW, 2, TAPK)        # (n, ph, di, pw, dj, k)
    taps = taps.transpose(0, 2, 4, 1, 3, 5)               # (n, di, dj, ph, pw, k)
    taps = taps.reshape(n_pad, 4, RR, KL)                 # (n, t, rr, u*16+k)
    patches = (taps.reshape(gt, BT, 4, RR, KL)
               .transpose(0, 3, 2, 1, 4)                  # (g, rr, t, b, k)
               .reshape(gt * RR, 4 * BT, KL))             # [gt*RR, 4*BT, KL] bf16

    # Block-diagonal conv weight [64, 256]: G copies of [16(taps+pad), 64(channels)].
    wkc = jnp.pad(conv_w.reshape(C_OUT, KH * KW).T,
                  ((0, TAPK - KH * KW), (0, 0)))                          # [16, 64]
    wc = (jnp.eye(G, dtype=jnp.float32)[:, None, :, None]
          * wkc[None, :, None, :]).reshape(KL, NL).astype(jnp.bfloat16)   # [64, 256]
    cb = jnp.tile(conv_b, G)[None, :].astype(jnp.float32)                 # [1, 256]

    # FC weight permuted to the kernel's (rr, u, c) feature order; classes padded.
    # torch feature index = c*196 + q with q = rr*4 + u  ->  kernel row (rr, u*64 + c).
    wf = (fc_w.astype(jnp.bfloat16)
          .reshape(num_classes, C_OUT, RR, G)             # (n, c, rr, u)
          .transpose(2, 3, 1, 0)                          # (rr, u, c, n)
          .reshape(RR, NL, num_classes))
    wf = jnp.pad(wf, ((0, 0), (0, 0), (0, ncls_pad - num_classes)))       # [49,256,P]
    fb = jnp.pad(fc_b, (0, ncls_pad - num_classes)).astype(jnp.float32)[None, :]

    out = pl.pallas_call(
        _make_kernel(BT),
        out_shape=jax.ShapeDtypeStruct((n_pad, ncls_pad), jnp.float32),
        grid_spec=pltpu.PrefetchScalarGridSpec(
            num_scalar_prefetch=0,
            grid=(gt,),
            in_specs=[
                pl.BlockSpec((RR, 4 * BT, KL), lambda g: (g, 0, 0)),      # patches
                pl.BlockSpec((KL, NL), lambda g: (0, 0)),                 # conv weight
                pl.BlockSpec((1, NL), lambda g: (0, 0)),                  # conv bias
                pl.BlockSpec((RR, NL, ncls_pad), lambda g: (0, 0, 0)),    # fc weight
                pl.BlockSpec((1, ncls_pad), lambda g: (0, 0)),            # fc bias
            ],
            out_specs=pl.BlockSpec((BT, ncls_pad), lambda g: (g, 0)),
        ),
        compiler_params=pltpu.CompilerParams(
            dimension_semantics=("parallel",),
            vmem_limit_bytes=48 * 1024 * 1024),
    )(patches, wc, cb, wf, fb)

    return out[:N, :num_classes]


def reference_forward(x, conv_w, conv_b, fc_w, fc_b):
    conv = jax.lax.conv_general_dilated(
        x, conv_w, window_strides=(1, 1), padding=((1, 1), (1, 1)),
        dimension_numbers=("NCHW", "OIHW", "NCHW"))
    conv = jax.nn.relu(conv + conv_b[None, :, None, None])
    pooled = jax.lax.reduce_window(conv, -jnp.inf, jax.lax.max,
                                   (1, 1, 2, 2), (1, 1, 2, 2), "VALID")
    feats = pooled.reshape(x.shape[0], -1)
    return feats @ fc_w.T + fc_b


if __name__ == "__main__":
    num_classes = 10
    key = jax.random.PRNGKey(0)
    k1, k2, k3, k4, k5 = jax.random.split(key, 5)

    # Deterministic synthetic parameters (shapes from SimpleCNN.__init__).
    conv_w = jax.random.normal(k1, (C_OUT, 1, KH, KW), jnp.float32) * 0.1
    conv_b = jax.random.normal(k2, (C_OUT,), jnp.float32) * 0.1
    fc_w = jax.random.normal(k3, (num_classes, FEAT), jnp.float32) * 0.01
    fc_b = jax.random.normal(k4, (num_classes,), jnp.float32) * 0.01

    x = jax.random.normal(k5, (2, 1, H, W), jnp.float32)   # NCHW like PyTorch

    out = jax.jit(simple_cnn_forward)(x, conv_w, conv_b, fc_w, fc_b)
    out = jax.block_until_ready(out)

    ref = reference_forward(x, conv_w, conv_b, fc_w, fc_b)
    assert out.shape == (2, num_classes)
    assert jnp.allclose(out, ref, rtol=2e-2, atol=2e-2), "Pallas result mismatch vs reference"

    print("KERNEL_OK")
</pallas_src>

<mosaic_0001>
module attributes {stable_mosaic.version = 11 : i64} {
  func.func @kernel(%arg0: i32, %arg1: memref<49x32x64xbf16, #tpu.memory_space<vmem>>, %arg2: memref<64x256xbf16, #tpu.memory_space<vmem>>, %arg3: memref<1x256xf32, #tpu.memory_space<vmem>>, %arg4: memref<49x256x128xbf16, #tpu.memory_space<vmem>>, %arg5: memref<1x128xf32, #tpu.memory_space<vmem>>, %arg6: memref<8x128xf32, #tpu.memory_space<vmem>>) attributes {dimension_semantics = [#tpu.dimension_semantics<parallel>], iteration_bounds = array<i64: 1>, scalar_prefetch = 0 : i64, scratch_operands = 0 : i64, tpu.core_type = #tpu.core_type<tc>, window_params = [{transform_indices = @transform_0, window_bounds = array<i64: 49, 32, 64>}, {pipeline_mode = #tpu.pipeline_mode<synchronous>, transform_indices = @transform_1, window_bounds = array<i64: 64, 256>}, {pipeline_mode = #tpu.pipeline_mode<synchronous>, transform_indices = @transform_2, window_bounds = array<i64: 1, 256>}, {pipeline_mode = #tpu.pipeline_mode<synchronous>, transform_indices = @transform_3, window_bounds = array<i64: 49, 256, 128>}, {pipeline_mode = #tpu.pipeline_mode<synchronous>, transform_indices = @transform_4, window_bounds = array<i64: 1, 128>}, {transform_indices = @transform_5, window_bounds = array<i64: 8, 128>}]} {
    %c0 = arith.constant 0 : index
    %c0_0 = arith.constant 0 : index
    %0 = vector.load %arg2[%c0, %c0_0] : memref<64x256xbf16, #tpu.memory_space<vmem>>, vector<64x256xbf16>
    %c0_1 = arith.constant 0 : index
    %c0_2 = arith.constant 0 : index
    %1 = vector.load %arg3[%c0_1, %c0_2] : memref<1x256xf32, #tpu.memory_space<vmem>>, vector<1x256xf32>
    %cst = arith.constant 0.000000e+00 : f32
    %2 = vector.broadcast %cst : f32 to vector<8x128xf32>
    %c0_3 = arith.constant 0 : index
    %c0_4 = arith.constant 0 : index
    %3 = vector.load %arg6[%c0_3, %c0_4] : memref<8x128xf32, #tpu.memory_space<vmem>>, vector<8x128xf32>
    tpu.vector_store %arg6[%c0_3, %c0_4], %2 {strides = array<i32>} : memref<8x128xf32, #tpu.memory_space<vmem>>, vector<8x128xf32>,
    %c0_i32 = arith.constant 0 : i32
    %c49_i32 = arith.constant 49 : i32
    %4 = arith.addi %c0_i32, %c49_i32 : i32
    %c1_i32 = arith.constant 1 : i32
    scf.for %arg7 = %c0_i32 to %4 step %c1_i32  : i32 {
      %10 = arith.index_cast %arg7 : i32 to index
      %c0_12 = arith.constant 0 : index
      %c0_13 = arith.constant 0 : index
      %11 = vector.load %arg1[%10, %c0_12, %c0_13] : memref<49x32x64xbf16, #tpu.memory_space<vmem>>, vector<1x32x64xbf16>
      %12 = vector.shape_cast %11 : vector<1x32x64xbf16> to vector<32x64xbf16>
      %cst_14 = arith.constant dense<0.000000e+00> : vector<32x256xf32>
      %13 = tpu.matmul %12, %0, %cst_14 {dimension_numbers = #tpu.dot_dimension_numbers<[1], [0], [0], [1], [0, 0, 1, 1], [], []>} : vector<32x64xbf16>, vector<64x256xbf16>, vector<32x256xf32> -> vector<32x256xf32>
      %14 = vector.broadcast %1 : vector<1x256xf32> to vector<32x256xf32>
      %15 = arith.addf %13, %14 : vector<32x256xf32>
      %cst_15 = arith.constant 0.000000e+00 : f32
      %16 = vector.broadcast %cst_15 : f32 to vector<32x256xf32>
      %17 = arith.maximumf %15, %16 : vector<32x256xf32>
      %18 = vector.extract_strided_slice %17 {offsets = [0, 0], sizes = [8, 256], strides = [1, 1]} : vector<32x256xf32> to vector<8x256xf32>
      %19 = vector.extract_strided_slice %17 {offsets = [8, 0], sizes = [8, 256], strides = [1, 1]} : vector<32x256xf32> to vector<8x256xf32>
      %20 = arith.maximumf %18, %19 : vector<8x256xf32>
      %21 = vector.extract_strided_slice %17 {offsets = [16, 0], sizes = [8, 256], strides = [1, 1]} : vector<32x256xf32> to vector<8x256xf32>
      %22 = vector.extract_strided_slice %17 {offsets = [24, 0], sizes = [8, 256], strides = [1, 1]} : vector<32x256xf32> to vector<8x256xf32>
      %23 = arith.maximumf %21, %22 : vector<8x256xf32>
      %24 = arith.maximumf %20, %23 : vector<8x256xf32>
      %c0_16 = arith.constant 0 : index
      %c0_17 = arith.constant 0 : index
      %25 = vector.load %arg6[%c0_16, %c0_17] : memref<8x128xf32, #tpu.memory_space<vmem>>, vector<8x128xf32>
      %26 = arith.truncf %24 : vector<8x256xf32> to vector<8x256xbf16>
      %27 = arith.index_cast %arg7 : i32 to index
      %c0_18 = arith.constant 0 : index
      %c0_19 = arith.constant 0 : index
      %28 = vector.load %arg4[%27, %c0_18, %c0_19] : memref<49x256x128xbf16, #tpu.memory_space<vmem>>, vector<1x256x128xbf16>
      %29 = vector.shape_cast %28 : vector<1x256x128xbf16> to vector<256x128xbf16>
      %cst_20 = arith.constant dense<0.000000e+00> : vector<8x128xf32>
      %30 = tpu.matmul %26, %29, %cst_20 {dimension_numbers = #tpu.dot_dimension_numbers<[1], [0], [0], [1], [0, 0, 1, 1], [], []>} : vector<8x256xbf16>, vector<256x128xbf16>, vector<8x128xf32> -> vector<8x128xf32>
      %31 = arith.addf %25, %30 : vector<8x128xf32>
      %c0_21 = arith.constant 0 : index
      %c0_22 = arith.constant 0 : index
      %32 = vector.load %arg6[%c0_21, %c0_22] : memref<8x128xf32, #tpu.memory_space<vmem>>, vector<8x128xf32>
      tpu.vector_store %arg6[%c0_21, %c0_22], %31 {strides = array<i32>} : memref<8x128xf32, #tpu.memory_space<vmem>>, vector<8x128xf32>,
    }
    %c49_i32_5 = arith.constant 49 : i32
    %c0_6 = arith.constant 0 : index
    %c0_7 = arith.constant 0 : index
    %5 = vector.load %arg6[%c0_6, %c0_7] : memref<8x128xf32, #tpu.memory_space<vmem>>, vector<8x128xf32>
    %c0_8 = arith.constant 0 : index
    %c0_9 = arith.constant 0 : index
    %6 = vector.load %arg5[%c0_8, %c0_9] : memref<1x128xf32, #tpu.memory_space<vmem>>, vector<1x128xf32>
    %7 = vector.broadcast %6 : vector<1x128xf32> to vector<8x128xf32>
    %8 = arith.addf %5, %7 : vector<8x128xf32>
    %c0_10 = arith.constant 0 : index
    %c0_11 = arith.constant 0 : index
    %9 = vector.load %arg6[%c0_10, %c0_11] : memref<8x128xf32, #tpu.memory_space<vmem>>, vector<8x128xf32>
    tpu.vector_store %arg6[%c0_10, %c0_11], %8 {strides = array<i32>} : memref<8x128xf32, #tpu.memory_space<vmem>>, vector<8x128xf32>,
    return
  }
  func.func @transform_0(%arg0: i32) -> (i32, i32, i32) {
    %c0_i32 = arith.constant 0 : i32
    %c0_i32_0 = arith.constant 0 : i32
    %c0_i32_1 = arith.constant 0 : i32
    return %arg0, %c0_i32, %c0_i32_0 : i32, i32, i32
  }
  func.func @transform_1(%arg0: i32) -> (i32, i32) {
    %c0_i32 = arith.constant 0 : i32
    %c0_i32_0 = arith.constant 0 : i32
    %c0_i32_1 = arith.constant 0 : i32
    return %c0_i32, %c0_i32_0 : i32, i32
  }
  func.func @transform_2(%arg0: i32) -> (i32, i32) {
    %c0_i32 = arith.constant 0 : i32
    %c0_i32_0 = arith.constant 0 : i32
    %c0_i32_1 = arith.constant 0 : i32
    return %c0_i32, %c0_i32_0 : i32, i32
  }
  func.func @transform_3(%arg0: i32) -> (i32, i32, i32) {
    %c0_i32 = arith.constant 0 : i32
    %c0_i32_0 = arith.constant 0 : i32
    %c0_i32_1 = arith.constant 0 : i32
    %c0_i32_2 = arith.constant 0 : i32
    return %c0_i32, %c0_i32_0, %c0_i32_1 : i32, i32, i32
  }
  func.func @transform_4(%arg0: i32) -> (i32, i32) {
    %c0_i32 = arith.constant 0 : i32
    %c0_i32_0 = arith.constant 0 : i32
    %c0_i32_1 = arith.constant 0 : i32
    return %c0_i32, %c0_i32_0 : i32, i32
  }
  func.func @transform_5(%arg0: i32) -> (i32, i32) {
    %c0_i32 = arith.constant 0 : i32
    %c0_i32_0 = arith.constant 0 : i32
    return %arg0, %c0_i32 : i32, i32
  }
}

</mosaic_0001>

<bundles_post_ra>
// kernel: tile.8
= control target key start
LH: loop header
LB: loop body
LE: loop exit
PB: predicated region body
PF: predicated region fallthrough
CT: control target
= control target key end

     0   :  { %s22_s0 = inlined_call_operand.vmem [shape: f32[64], index: 0, kind: input, shape index: {}]   ;;  %s23_s1 = inlined_call_operand.vmem [shape: f32[4,64], index: 1, kind: output, shape index: {}]  }
   0x1   :  { %v4_v0 = vld [vmem:[%s22_s0] ss:$0 sm:$0xff] }
   0x2   :  { %5 = vst [vmem:[%s23_s1] sm:$0xf] %v4_v0 }

// kernel: tile.9
= control target key start
LH: loop header
LB: loop body
LE: loop exit
PB: predicated region body
PF: predicated region fallthrough
CT: control target
= control target key end

     0   :  { %s7_s8 = smov 3  ;;  %vm9_vm0 = vcmask 523264   ;;  %s34_s9 = smov 64   ;;  %vm16_vm1 = vcmask 1048064   ;;  %s54_s0 = inlined_call_operand.vmem [shape: f32[4,64], index: 0, kind: input, shape index: {}]   ;;  %s55_s1 = inlined_call_operand.vmem [shape: f32[1,256], index: 1, kind: output, shape index: {}]  }
   0x1   :  { %v5_v0 = vld [vmem:[%s54_s0] sm:$0xf]  ;;  %s12_s0 = smov 3 }
   0x2   :  { %6 = vst [vmem:[#allocation1] sm:$0xf] %v5_v0 }
   0x9   :  { %v13_v1 = vld [vmem:[#allocation1 + $0x1] ss:$2 sm:%s12_s0]   ;;  %v8_v2 = vld [vmem:[#allocation1] ss:$2 sm:%s7_s8]  }
   0xa   :  { %14 = vrot.lane.b32.xlu0 %v13_v1, %s34_s9  ;;  %10 = vst.msk [vmem:[#allocation0] ss:$8 sm:$0x3] %vm9_vm0, %v8_v2  }
  0x7c   :  { %v15_v3 = vpop.permute.xlu0 %14  }
  0x7d   :  { %17 = vst.msk [vmem:[#allocation0] ss:$8 sm:$0x3] %vm16_vm1, %v15_v3  }
  0x84   :  { %v22_v4 = vld [vmem:[#allocation0] sm:$0x1]  ;;  %v27_v5 = vld [vmem:[#allocation0 + $0x8] sm:$0x1] }
  0x85   :  { %25 = vst [vmem:[%s55_s1] sm:$0x1] %v22_v4  ;;  %32 = vst [vmem:[%s55_s1 + $0x1] sm:$0x1] %v27_v5 }

// kernel: simple_cnn_forward.1
= control target key start
LH: loop header
LB: loop body
LE: loop exit
PB: predicated region body
PF: predicated region fallthrough
CT: control target
= control target key end

     0   :  { %v471_v3 = vmov 0.0   ;;  %s551_s13 = smov 0   ;;  %s618_s0 = inlined_call_operand.vmem [shape: bf16[49,32,64], index: 0, kind: input, shape index: {}]   ;;  %s619_s1 = inlined_call_operand.vmem [shape: bf16[64,256], index: 1, kind: input, shape index: {}]   ;;  %s620_s2 = inlined_call_operand.vmem [shape: f32[1,256], index: 2, kind: input, shape index: {}]   ;;  %s621_s3 = inlined_call_operand.vmem [shape: bf16[49,256,128], index: 3, kind: input, shape index: {}]   ;;  %s622_s4 = inlined_call_operand.vmem [shape: f32[1,128], index: 4, kind: input, shape index: {}]   ;;  %s623_s5 = inlined_call_operand.vmem [shape: f32[8,128], index: 5, kind: output, shape index: {}]  }
   0x1   :  { %v506_v0 = vld [vmem:[%s619_s1] sm:$0xff]  ;;  %v511_v1 = vld [vmem:[%s619_s1 + $0x8] sm:$0xff]  ;;  %v516_v2 = vld [vmem:[%s619_s1 + $0x10] sm:$0xff]  ;;  %30 = vst [vmem:[%s623_s5] sm:$0xff] %v471_v3 }
   0x2   :  { %v524_v4 = vld [vmem:[%s619_s1 + $0x18] sm:$0xff]  ;;  %v529_v5 = vld [vmem:[%s619_s1 + $0x20] sm:$0xff]  ;;  %v534_v6 = vld [vmem:[%s619_s1 + $0x28] sm:$0xff] }
   0x3   :  { %v539_v7 = vld [vmem:[%s619_s1 + $0x30] sm:$0xff]  ;;  %v544_v8 = vld [vmem:[%s619_s1 + $0x38] sm:$0xff]  ;;  %v549_v9 = vld [vmem:[%s620_s2] sm:$0x3] }
   0x4 LB: > { %v389_v10 = vcombine.high %v539_v7, %v544_v8  ;;  %v388_v11 = vcombine.low %v539_v7, %v544_v8  ;;  %v387_v12 = vcombine.high %v529_v5, %v534_v6  ;;  %s411_s1 = sshll.u32 %s469_s13, 4  ;;  %s412_s2 = sshll.u32 %s469_s13, 7  ;;  %v386_v13 = vcombine.low %v529_v5, %v534_v6  ;;  %s469_s13 = sphi %s551_s13, %s36_s13  }
   0x5   : > { %v472_v14 = vmov 0   ;;  %s39_s16 = scalar_lea.vmem %s618_s0, %s411_s1  ;;  %s572_s19 = scalar_lea.vmem %s621_s3, %s412_s2  ;;  %v385_v15 = vcombine.high %v516_v2, %v524_v4  ;;  %v384_v17 = vcombine.low %v516_v2, %v524_v4  ;;  %v383_v19 = vcombine.high %v506_v0, %v511_v1 }
   0x6   : > { %120 = vmatprep.subr.bf16.mxu0 %v389_v10  ;;  %144 = vmatprep.mubr.bf16.mxu0 %v472_v14  ;;  %v447_v16 = vld [vmem:[%s572_s19 + $0x78] sm:$0xff]   ;;  %v449_v20 = vld [vmem:[%s572_s19 + $0x70] sm:$0xff]   ;;  %vm105_vm0 = vcmask 523264   ;;  %v382_v22 = vcombine.low %v506_v0, %v511_v1  ;;  %v445_v23 = vld [vmem:[%s39_s16] sm:$0xff]   ;;  %v45_v37 = vlaneseq  ;;  %s36_s13 = sadd.s32 1, %s469_s13  }
   0x7   : > { %121 = vmatpush1.bf16.msra.mxu0 %v388_v11  ;;  %v448_v18 = vld [vmem:[%s572_s19 + $0x38] sm:$0xff]   ;;  %413 = vmatprep.subr.bf16.mxu1 %v447_v16  ;;  %v450_v21 = vld [vmem:[%s572_s19 + $0x30] sm:$0xff]   ;;  %v446_v24 = vld [vmem:[%s39_s16 + $0x8] sm:$0xff]   ;;  %p33_p0 = scmp.ge.s32.totalorder %s36_s13, 49  }
   0x8   : > { %122 = vmatprep.subr.bf16.mxu0 %v387_v12  ;;  %414 = vmatpush3.bf16.msra.mxu1 %v448_v18  ;;  %v451_v25 = vld [vmem:[%s572_s19 + $0x68] sm:$0xff]   ;;  %v453_v27 = vld [vmem:[%s572_s19 + $0x60] sm:$0xff]   ;;  %v455_v29 = vld [vmem:[%s572_s19 + $0x58] sm:$0xff]   ;;  %v46_v38 = vshrl.u32 %v45_v37, 7 }
   0x9   : > { %415 = vmatprep.subr.bf16.mxu1 %v449_v20  ;;  %v452_v26 = vld [vmem:[%s572_s19 + $0x28] sm:$0xff]   ;;  %v454_v28 = vld [vmem:[%s572_s19 + $0x20] sm:$0xff]   ;;  %v456_v30 = vld [vmem:[%s572_s19 + $0x18] sm:$0xff]  }
   0xa   : > { %v457_v31 = vld [vmem:[%s572_s19 + $0x50] sm:$0xff]   ;;  %v459_v33 = vld [vmem:[%s572_s19 + $0x48] sm:$0xff]   ;;  %v461_v35 = vld [vmem:[%s572_s19 + $0x40] sm:$0xff]   ;;  %v47_v41 = vsub.s32 0, %v46_v38  ;;  %v51_v43 = vsub.s32 1, %v46_v38 }
   0xb   : > { %123 = vmatpush1.bf16.msra.mxu0 %v386_v13  ;;  %v458_v32 = vld [vmem:[%s572_s19 + $0x10] sm:$0xff]   ;;  %v460_v34 = vld [vmem:[%s572_s19 + $0x8] sm:$0xff]   ;;  %v462_v36 = vld [vmem:[%s572_s19] sm:$0xff]  }
   0xc   : > { %124 = vmatprep.subr.bf16.mxu0 %v385_v15  ;;  %416 = vmatpush3.bf16.msra.mxu1 %v450_v21  ;;  %v48_v45 = vrot.slane %v549_v9, %v47_v41  ;;  %v52_v47 = vrot.slane %v549_v9, %v51_v43  ;;  %v179_v21 = vld [vmem:[%s623_s5] sm:$0xff] }
   0xd   : > { %417 = vmatprep.subr.bf16.mxu1 %v451_v25 }
   0xf   : > { %125 = vmatpush1.bf16.msra.mxu0 %v384_v17 }
  0x10   : > { %126 = vmatprep.subr.bf16.mxu0 %v383_v19  ;;  %418 = vmatpush3.bf16.msra.mxu1 %v452_v26 }
  0x11   : > { %419 = vmatprep.subr.bf16.mxu1 %v453_v27 }
  0x13   : > { %127 = vmatpush1.bf16.msra.mxu0 %v382_v22 }
  0x14   : > { %420 = vmatpush3.bf16.msra.mxu1 %v454_v28  ;;  %v410_v28 = vld [vmem:[%s622_s4] ss:$0 sm:$0xff] (%p33_p0) }
  0x15   : > { %421 = vmatprep.subr.bf16.mxu1 %v455_v29 }
  0x16   : > { %390 = vmatmul.mubr.msk.bf16.vlgmr.msra.gmra.mxu0 %vm105_vm0, %v445_v23 }
  0x17   : > { %154 = vmatprep.mubr.bf16.mxu0 %v472_v14 }
  0x18   : > { %422 = vmatpush3.bf16.msra.mxu1 %v456_v30 }
  0x19   : > { %423 = vmatprep.subr.bf16.mxu1 %v457_v31 }
  0x1c   : > { %424 = vmatpush3.bf16.msra.mxu1 %v458_v32 }
  0x1d   : > { %425 = vmatprep.subr.bf16.mxu1 %v459_v33 }
  0x1e   : > { %391 = vmatmul.mubr.msk.bf16.gmra.mxu0 %vm105_vm0, %v446_v24 }
  0x20   : > { %426 = vmatpush3.bf16.msra.mxu1 %v460_v34 }
  0x21   : > { %427 = vmatprep.subr.bf16.mxu1 %v461_v35 }
  0x24   : > { %428 = vmatpush3.bf16.msra.mxu1 %v462_v36 }
  0xd6   : > { %v146_v39 = vpop.f32.mrf.mxu0 }
  0xd7   : > { %v147_v52 = vadd.f32 %v146_v39, %v48_v45 }
  0xd8   : > { %v148_v40 = vpop.f32.mrf.mxu0 }
  0xd9   : > { %v149_v54 = vadd.f32 %v148_v40, %v52_v47  ;;  %v165_v63 = vmax.f32 %v147_v52, 0.0 }
  0xda   : > { %v150_v42 = vpop.f32.mrf.mxu0 }
  0xdb   : > { %v151_v48 = vadd.f32 %v150_v42, %v48_v45  ;;  %v166_v3 = vmax.f32 %v149_v54, 0.0 }
  0xdc   : > { %v152_v44 = vpop.f32.mrf.mxu0 }
  0xdd   : > { %v153_v50 = vadd.f32 %v152_v44, %v52_v47  ;;  %v167_v57 = vmax.f32 %v151_v48, 0.0 }
  0xde   : > { %v156_v46 = vpop.f32.mrf.mxu0 }
  0xdf   : > { %v157_v51 = vadd.f32 %v156_v46, %v48_v45  ;;  %v168_v59 = vmax.f32 %v153_v50, 0.0  ;;  %v173_v13 = vmax.f32 %v165_v63, %v167_v57 }
  0xe0   : > { %v158_v49 = vpop.f32.mrf.mxu0 }
  0xe1   : > { %v159_v55 = vadd.f32 %v158_v49, %v52_v47  ;;  %v169_v60 = vmax.f32 %v157_v51, 0.0  ;;  %v174_v14 = vmax.f32 %v166_v3, %v168_v59 }
  0xe2   : > { %v160_v53 = vpop.f32.mrf.mxu0 }
  0xe3   : > { %v161_v56 = vadd.f32 %v160_v53, %v48_v45  ;;  %v170_v10 = vmax.f32 %v159_v55, 0.0 }
  0xe4   : > { %v162_v58 = vpop.f32.mrf.mxu0 }
  0xe5   : > { %v171_v61 = vmax.f32 %v161_v56, 0.0  ;;  %v163_v62 = vadd.f32 %v162_v58, %v52_v47 }
  0xe7   : > { %v175_v11 = vmax.f32 %v169_v60, %v171_v61  ;;  %v172_v12 = vmax.f32 %v163_v62, 0.0 }
  0xe9   : > { %v176_v15 = vmax.f32 %v170_v10, %v172_v12  ;;  %v177_v16 = vmax.f32 %v173_v13, %v175_v11 }
  0xeb   : > { %v178_v17 = vmax.f32 %v174_v14, %v176_v15  ;;  %v180_v19 = vpack.c.bf16 %v177_v16, %v177_v16 }
  0xed   : > { %v181_v18 = vpack.c.bf16 %v178_v17, %v178_v17 }
  0xef   : > { %345 = vmatprep.mubr.bf16.mxu1 %v181_v18 }
  0xf0   : > { %346 = vmatmul.mubr.bf16.vlgmr.msra.gmra.mxu1 %v180_v19 }
 0x1b0   : > { %v429_v20 = vpop.f32.mrf.mxu1 }
 0x1b2   : > { %v430_v22 = vpop.f32.mrf.mxu1 }
 0x1b3   : > { %v431_v23 = vadd.f32 %v430_v22, %v429_v20  ;;  %35 = sbr.rel (!%p33_p0) target bundleno = 4 (0x4), region = 49 }
 0x1b4   : > { %v432_v24 = vpop.f32.mrf.mxu1 }
 0x1b5   : > { %v353_v25 = vadd.f32 %v431_v23, %v179_v21 }
 0x1b6   : > { %v433_v26 = vpop.f32.mrf.mxu1 }
 0x1b7   : > { %354 = vst [vmem:[%s623_s5] sm:$0xff] %v353_v25 }
 0x1be   :  { %v355_v27 = vld [vmem:[%s623_s5] sm:$0xff] }
 0x1bf   :  { %v363_v29 = vadd.f32 %v410_v28, %v355_v27 }
 0x1c1   :  { %364 = vst [vmem:[%s623_s5] sm:$0xff] %v363_v29 }

</bundles_post_ra>
